<compile_context>
chip_gen: v5e
topology: v5e:2x2
jax: 0.10.0
libtpu: 0.0.40
codegen_flags: <defaults>
</compile_context>

<pallas_src>
import jax
import jax.numpy as jnp
from jax.experimental import pallas as pl
from jax.experimental.pallas import tpu as pltpu

LANE = 128          # lane width: pad feature dims to multiples of this for dense vst
SUBLANE = 8         # f32 sublane height
ROW_BLOCK = 256     # preferred rows per grid step when batches are large


def _round_up(n, m):
    return ((n + m - 1) // m) * m


def _pad_to(a, shape):
    pads = [(0, t - s) for s, t in zip(a.shape, shape)]
    return jnp.pad(a, pads)


# ----------------------------- fused Pallas kernel ---------------------------

def _fused_mlp_kernel(x_ref, w1_ref, b1_ref, w2_ref, b2_ref, o_ref):
    # x: (tm, K) f32, w1: (K, Hp) bf16, b1: (1, Hp) f32,
    # w2: (Hp, Np) bf16, b2: (1, Np) f32  ->  o: (tm, Np) f32
    x = x_ref[...].astype(jnp.bfloat16)
    # fc1 + bias + ReLU epilogue (f32 accumulation)
    h = jnp.dot(x, w1_ref[...], preferred_element_type=jnp.float32)
    h = jnp.maximum(h + b1_ref[...], 0.0)
    # fc2 + bias (f32 accumulation)
    y = jnp.dot(h.astype(jnp.bfloat16), w2_ref[...],
                preferred_element_type=jnp.float32)
    o_ref[...] = (y + b2_ref[...]).astype(o_ref.dtype)


def fused_mlp(x_pad, w1p, b1p, w2p, b2p, *, tm):
    """Fused fc1 -> relu -> fc2 over a 1-D row grid.

    Rows are tiled (tm per step) so launch overhead is amortized over large
    batches; weights/biases use constant-index BlockSpecs so they are loaded
    into VMEM once and stay resident across grid steps.
    """
    m_pad, k = x_pad.shape
    hp = w1p.shape[1]
    n_pad = w2p.shape[1]
    grid = (m_pad // tm,)

    cost = pl.CostEstimate(
        flops=2 * m_pad * (k * hp + hp * n_pad),
        transcendentals=0,
        bytes_accessed=(m_pad * k * 4          # x (f32)
                        + k * hp * 2           # w1 (bf16)
                        + hp * 4               # b1 (f32)
                        + hp * n_pad * 2       # w2 (bf16)
                        + n_pad * 4            # b2 (f32)
                        + m_pad * n_pad * 4))  # out (f32)

    return pl.pallas_call(
        _fused_mlp_kernel,
        out_shape=jax.ShapeDtypeStruct((m_pad, n_pad), jnp.float32),
        grid=grid,
        in_specs=[
            pl.BlockSpec((tm, k), lambda i: (i, 0)),       # x tile per step
            pl.BlockSpec((k, hp), lambda i: (0, 0)),       # w1: VMEM-resident
            pl.BlockSpec((1, hp), lambda i: (0, 0)),       # b1: VMEM-resident
            pl.BlockSpec((hp, n_pad), lambda i: (0, 0)),   # w2: VMEM-resident
            pl.BlockSpec((1, n_pad), lambda i: (0, 0)),    # b2: VMEM-resident
        ],
        out_specs=pl.BlockSpec((tm, n_pad), lambda i: (i, 0)),
        compiler_params=pltpu.CompilerParams(
            dimension_semantics=("parallel",),          # v7x: split rows across TCs
            vmem_limit_bytes=32 * 1024 * 1024),         # explicit, fits v5e/v6e/v7x
        cost_estimate=cost,
    )(x_pad, w1p, b1p, w2p, b2p)


# ------------------------------ Wrapped model --------------------------------

class TinyMLP:
    """fc1 (32->64) -> relu -> fc2 (64->16); named sub-modules mimic nn.Sequential.

    Weights are zero-padded once at construction so the in-kernel feature dims
    (hidden, out) are multiples of 128 lanes, and stored as bf16 (f32 accumulate
    in-kernel).  The logical (batch, 16) result is sliced out of the padded slab
    inside the same jitted program.
    """

    def __init__(self, w1, b1, w2, b2):
        self.d_in, self.d_hidden = w1.shape
        self.d_out = w2.shape[1]
        hp = _round_up(self.d_hidden, LANE)
        npad = _round_up(self.d_out, LANE)
        # zero-padding keeps the math exact: padded hidden columns are 0 after
        # ReLU, padded w2 rows/cols are 0, padded output columns are dropped.
        self.w1p = _pad_to(w1, (self.d_in, hp)).astype(jnp.bfloat16)
        self.b1p = _pad_to(b1, (1, hp)).astype(jnp.float32)
        self.w2p = _pad_to(w2, (hp, npad)).astype(jnp.bfloat16)
        self.b2p = _pad_to(b2, (1, npad)).astype(jnp.float32)
        # One jitted program: pad rows -> one pallas_call -> cheap XLA slice.
        self._forward = jax.jit(self._forward_impl)

    def _forward_impl(self, x):
        m = x.shape[0]
        # Row tile: big enough to amortize per-step overhead on large batches,
        # but never larger than the (sublane-rounded) batch itself.
        tm = min(ROW_BLOCK, _round_up(m, SUBLANE))
        m_pad = _round_up(m, tm)
        x_pad = _pad_to(x.astype(jnp.float32), (m_pad, self.d_in))
        y_pad = fused_mlp(x_pad, self.w1p, self.b1p, self.w2p, self.b2p, tm=tm)
        return y_pad[:m, : self.d_out]

    def named_output_shapes(self, x_shape):
        """(name, output_shape) per named sub-module, in forward-hook firing order."""
        m = x_shape[0]
        return [
            ("fc1", (m, self.d_hidden)),
            ("relu", (m, self.d_hidden)),
            ("fc2", (m, self.d_out)),
            ("", (m, self.d_out)),   # root module hook fires last
        ]

    def __call__(self, x):
        return self._forward(x)


class OutputShapeHook:
    """JAX equivalent of the PyTorch wrapper: print each layer's output shape,
    then return the model's output unchanged."""

    def __init__(self, model, verbose_every_call=False):
        self.model = model
        self.verbose_every_call = verbose_every_call
        self._printed = False

    def __call__(self, x):
        # TODO(synk): PyTorch hooks fire at runtime on tensors inside forward();
        # with a fused, jitted kernel that is not expressible, so the (static)
        # per-layer output shapes are printed host-side instead — once by default,
        # to keep Python prints out of the hot per-call path.
        if self.verbose_every_call or not self._printed:
            for name, shape in self.model.named_output_shapes(x.shape):
                print('%s: %s' % (name, str(tuple(shape))))
            self._printed = True
        return self.model(x)


# ---------------------------------- main -------------------------------------

if __name__ == "__main__":
    key = jax.random.PRNGKey(0)
    k1, k2, k3, k4, kx = jax.random.split(key, 5)

    batch, d_in, d_hidden, d_out = 8, 32, 64, 16

    # Deterministic parameter init (synthetic weights, not a checkpoint).
    w1 = 0.1 * jax.random.normal(k1, (d_in, d_hidden), jnp.float32)
    b1 = 0.1 * jax.random.normal(k2, (1, d_hidden), jnp.float32)
    w2 = 0.1 * jax.random.normal(k3, (d_hidden, d_out), jnp.float32)
    b2 = 0.1 * jax.random.normal(k4, (1, d_out), jnp.float32)

    x = jax.random.normal(kx, (batch, d_in), jnp.float32)

    hooked_model = OutputShapeHook(TinyMLP(w1, b1, w2, b2))
    y = hooked_model(x)
    jax.block_until_ready(y)
    assert y.shape == (batch, d_out)

    # Reference emulating the kernel's bf16-operand / f32-accumulate math.
    f32 = jnp.float32
    x_bf = x.astype(jnp.bfloat16).astype(f32)
    w1_bf = w1.astype(jnp.bfloat16).astype(f32)
    w2_bf = w2.astype(jnp.bfloat16).astype(f32)
    h_ref = jnp.maximum(x_bf @ w1_bf + b1, 0.0)
    ref_bf = h_ref.astype(jnp.bfloat16).astype(f32) @ w2_bf + b2
    assert jnp.allclose(y, ref_bf, atol=1e-3), "mismatch vs bf16-emulated reference"

    # Loose check against the pure f32 reference (bf16 weight rounding only).
    ref_f32 = jnp.maximum(x @ w1 + b1, 0.0) @ w2 + b2
    assert jnp.allclose(y, ref_f32, atol=5e-2), "mismatch vs f32 reference"

    print("KERNEL_OK")
</pallas_src>

<mosaic_0001>
module attributes {stable_mosaic.version = 11 : i64} {
  func.func @_fused_mlp_kernel(%arg0: i32, %arg1: memref<8x32xf32, #tpu.memory_space<vmem>>, %arg2: memref<32x128xbf16, #tpu.memory_space<vmem>>, %arg3: memref<1x128xf32, #tpu.memory_space<vmem>>, %arg4: memref<128x128xbf16, #tpu.memory_space<vmem>>, %arg5: memref<1x128xf32, #tpu.memory_space<vmem>>, %arg6: memref<8x128xf32, #tpu.memory_space<vmem>>) attributes {dimension_semantics = [#tpu.dimension_semantics<parallel>], iteration_bounds = array<i64: 1>, scalar_prefetch = 0 : i64, scratch_operands = 0 : i64, tpu.core_type = #tpu.core_type<tc>, window_params = [{transform_indices = @transform_0, window_bounds = array<i64: 8, 32>}, {pipeline_mode = #tpu.pipeline_mode<synchronous>, transform_indices = @transform_1, window_bounds = array<i64: 32, 128>}, {pipeline_mode = #tpu.pipeline_mode<synchronous>, transform_indices = @transform_2, window_bounds = array<i64: 1, 128>}, {pipeline_mode = #tpu.pipeline_mode<synchronous>, transform_indices = @transform_3, window_bounds = array<i64: 128, 128>}, {pipeline_mode = #tpu.pipeline_mode<synchronous>, transform_indices = @transform_4, window_bounds = array<i64: 1, 128>}, {transform_indices = @transform_5, window_bounds = array<i64: 8, 128>}]} {
    %c0 = arith.constant 0 : index
    %c0_0 = arith.constant 0 : index
    %0 = vector.load %arg1[%c0, %c0_0] : memref<8x32xf32, #tpu.memory_space<vmem>>, vector<8x32xf32>
    %1 = arith.truncf %0 : vector<8x32xf32> to vector<8x32xbf16>
    %c0_1 = arith.constant 0 : index
    %c0_2 = arith.constant 0 : index
    %2 = vector.load %arg2[%c0_1, %c0_2] : memref<32x128xbf16, #tpu.memory_space<vmem>>, vector<32x128xbf16>
    %cst = arith.constant dense<0.000000e+00> : vector<8x128xf32>
    %3 = tpu.matmul %1, %2, %cst {dimension_numbers = #tpu.dot_dimension_numbers<[1], [0], [0], [1], [0, 0, 1, 1], [], []>} : vector<8x32xbf16>, vector<32x128xbf16>, vector<8x128xf32> -> vector<8x128xf32>
    %c0_3 = arith.constant 0 : index
    %c0_4 = arith.constant 0 : index
    %4 = vector.load %arg3[%c0_3, %c0_4] : memref<1x128xf32, #tpu.memory_space<vmem>>, vector<1x128xf32>
    %5 = vector.broadcast %4 : vector<1x128xf32> to vector<8x128xf32>
    %6 = arith.addf %3, %5 : vector<8x128xf32>
    %cst_5 = arith.constant 0.000000e+00 : f32
    %7 = vector.broadcast %cst_5 : f32 to vector<8x128xf32>
    %8 = arith.maximumf %6, %7 : vector<8x128xf32>
    %9 = arith.truncf %8 : vector<8x128xf32> to vector<8x128xbf16>
    %c0_6 = arith.constant 0 : index
    %c0_7 = arith.constant 0 : index
    %10 = vector.load %arg4[%c0_6, %c0_7] : memref<128x128xbf16, #tpu.memory_space<vmem>>, vector<128x128xbf16>
    %cst_8 = arith.constant dense<0.000000e+00> : vector<8x128xf32>
    %11 = tpu.matmul %9, %10, %cst_8 {dimension_numbers = #tpu.dot_dimension_numbers<[1], [0], [0], [1], [0, 0, 1, 1], [], []>} : vector<8x128xbf16>, vector<128x128xbf16>, vector<8x128xf32> -> vector<8x128xf32>
    %c0_9 = arith.constant 0 : index
    %c0_10 = arith.constant 0 : index
    %12 = vector.load %arg5[%c0_9, %c0_10] : memref<1x128xf32, #tpu.memory_space<vmem>>, vector<1x128xf32>
    %13 = vector.broadcast %12 : vector<1x128xf32> to vector<8x128xf32>
    %14 = arith.addf %11, %13 : vector<8x128xf32>
    %c0_11 = arith.constant 0 : index
    %c0_12 = arith.constant 0 : index
    %15 = vector.load %arg6[%c0_11, %c0_12] : memref<8x128xf32, #tpu.memory_space<vmem>>, vector<8x128xf32>
    tpu.vector_store %arg6[%c0_11, %c0_12], %14 {strides = array<i32>} : memref<8x128xf32, #tpu.memory_space<vmem>>, vector<8x128xf32>,
    return
  }
  func.func @transform_0(%arg0: i32) -> (i32, i32) {
    %c0_i32 = arith.constant 0 : i32
    %c0_i32_0 = arith.constant 0 : i32
    return %arg0, %c0_i32 : i32, i32
  }
  func.func @transform_1(%arg0: i32) -> (i32, i32) {
    %c0_i32 = arith.constant 0 : i32
    %c0_i32_0 = arith.constant 0 : i32
    %c0_i32_1 = arith.constant 0 : i32
    return %c0_i32, %c0_i32_0 : i32, i32
  }
  func.func @transform_2(%arg0: i32) -> (i32, i32) {
    %c0_i32 = arith.constant 0 : i32
    %c0_i32_0 = arith.constant 0 : i32
    %c0_i32_1 = arith.constant 0 : i32
    return %c0_i32, %c0_i32_0 : i32, i32
  }
  func.func @transform_3(%arg0: i32) -> (i32, i32) {
    %c0_i32 = arith.constant 0 : i32
    %c0_i32_0 = arith.constant 0 : i32
    %c0_i32_1 = arith.constant 0 : i32
    return %c0_i32, %c0_i32_0 : i32, i32
  }
  func.func @transform_4(%arg0: i32) -> (i32, i32) {
    %c0_i32 = arith.constant 0 : i32
    %c0_i32_0 = arith.constant 0 : i32
    %c0_i32_1 = arith.constant 0 : i32
    return %c0_i32, %c0_i32_0 : i32, i32
  }
  func.func @transform_5(%arg0: i32) -> (i32, i32) {
    %c0_i32 = arith.constant 0 : i32
    %c0_i32_0 = arith.constant 0 : i32
    return %arg0, %c0_i32 : i32, i32
  }
}

</mosaic_0001>

<bundles_post_ra>
// kernel: _forward_impl.1
= control target key start
LH: loop header
LB: loop body
LE: loop exit
PB: predicated region body
PF: predicated region fallthrough
CT: control target
= control target key end

     0   :  { %10 = vsyncpa [#allocation3], 0  ;;  %s466_s0 = inlined_call_operand.hbm [shape: f32[8,32], index: 0, kind: input, shape index: {}]   ;;  %s467_s1 = inlined_call_operand.hbm [shape: bf16[32,128], index: 1, kind: input, shape index: {}]   ;;  %s468_s2 = inlined_call_operand.hbm [shape: f32[1,128], index: 2, kind: input, shape index: {}]   ;;  %s469_s3 = inlined_call_operand.hbm [shape: bf16[128,128], index: 3, kind: input, shape index: {}]   ;;  %s470_s4 = inlined_call_operand.vmem [shape: f32[1,128], index: 4, kind: input, shape index: {}]   ;;  %s471_s5 = inlined_call_operand.hbm [shape: f32[8,128], index: 5, kind: output, shape index: {}]  }
   0x1   :  { %11 = vsyncpa [#allocation6], 0 }
   0x2   :  { %12 = vsyncpa [#allocation9], 0  ;;  %s29_s20 = sshll.u32 %s467_s1, 4  ;;  %s30_s20 = int_to_ptr.hbm [resolvable:$true] %s29_s20 }
   0x3   :  { %13 = vsyncpa [#allocation4], 0  ;;  %s411_s21 = smov [#allocation5]   ;;  %s19_s25 = sshll.u32 %s466_s0, 4  ;;  %s20_s25 = int_to_ptr.hbm [resolvable:$true] %s19_s25 }
   0x4   :  { %s31_s22 = sshll.u32 %s411_s21, 4  ;;  %s412_s26 = smov 64   ;;  %s32_s22 = int_to_ptr.vmem [resolvable:$true] %s31_s22 }
   0x5   :  { %s413_s27 = smov 4   ;;  %s414_s28 = smov [#allocation2]  }
   0x6   :  { %37 = dma.hbm_to_vmem [thread:$0]  %s30_s20, 256, %s32_s22, [#allocation6], %s412_s26, %s412_s26, %s413_s27  }
   0x7   :  { %s21_s29 = sshll.u32 %s414_s28, 4  ;;  %s43_s7 = sshll.u32 %s468_s2, 4  ;;  %s22_s29 = int_to_ptr.vmem [resolvable:$true] %s21_s29  ;;  %s44_s7 = int_to_ptr.hbm [resolvable:$true] %s43_s7 }
   0x8   :  { %24 = dma.hbm_to_vmem [thread:$0]  %s20_s25, 128, %s22_s29, [#allocation3]  }
   0x9   :  { %s53_s9 = sshll.u32 %s469_s3, 4  ;;  %s415_s10 = smov [#allocation7]   ;;  %s54_s9 = int_to_ptr.hbm [resolvable:$true] %s53_s9 }
   0xa   :  { %s45_s11 = sshll.u32 %s415_s10, 4  ;;  %s416_s0 = smov [#allocation8]   ;;  %s46_s11 = int_to_ptr.vmem [resolvable:$true] %s45_s11 }
   0xb   :  { %48 = dma.hbm_to_vmem [thread:$0]  %s44_s7, 16, %s46_s11, [#allocation6]  }
   0xc   :  { %s55_s12 = sshll.u32 %s416_s0, 4  ;;  %s56_s12 = int_to_ptr.vmem [resolvable:$true] %s55_s12 }
   0xd   :  { %61 = dma.hbm_to_vmem [thread:$0]  %s54_s9, 1024, %s56_s12, [#allocation9], %s412_s26, %s412_s26, %s413_s27  }
   0xe   :  { %403 = dma.done.wait [#allocation3], 128  }
   0xf   :  { %404 = vsyncadd [#allocation3], 4294967168 }
  0x10   :  { %405 = dma.done.wait [#allocation6], 272  }
  0x11   :  { %406 = vsyncadd [#allocation6], 4294967024 }
  0x12   :  { %407 = dma.done.wait [#allocation9], 1024  }
  0x13   :  { %408 = vsyncadd [#allocation9], 4294966272  ;;  %v265_v0 = vld [vmem:[#allocation5 + $0x8] sm:$0xff]  ;;  %v264_v2 = vld [vmem:[#allocation5] sm:$0xff]  ;;  %vm103_vm0 = vcmask 261120   ;;  %s417_s13 = smov [#allocation10]  }
  0x14   :  { %v273_v1 = vld [vmem:[#allocation8 + $0x38] sm:$0xff]  ;;  %113 = vmatpush.bf16.msra.mxu0 %v265_v0  ;;  %v81_v3 = vld [vmem:[#allocation2] sm:$0xff]  ;;  %v272_v4 = vld [vmem:[#allocation8 + $0x30] sm:$0xff]  ;;  %s209_s14 = sshll.u32 %s417_s13, 4  ;;  %s211_s17 = sshll.u32 %s471_s5, 4  ;;  %s210_s14 = int_to_ptr.vmem [resolvable:$true] %s209_s14  ;;  %s212_s17 = int_to_ptr.hbm [resolvable:$true] %s211_s17 }
  0x15   :  { %190 = vmatpush.bf16.msra.mxu1 %v273_v1  ;;  %v82_v5 = vpack.c.bf16 %v81_v3, %v81_v3  ;;  %v271_v6 = vld [vmem:[#allocation8 + $0x28] sm:$0xff]  ;;  %v270_v7 = vld [vmem:[#allocation8 + $0x20] sm:$0xff]  ;;  %v269_v8 = vld [vmem:[#allocation8 + $0x18] sm:$0xff] }
  0x16   :  { %v268_v9 = vld [vmem:[#allocation8 + $0x10] sm:$0xff]  ;;  %v267_v10 = vld [vmem:[#allocation8 + $0x8] sm:$0xff]  ;;  %v266_v11 = vld [vmem:[#allocation8] sm:$0xff] }
  0x17   :  { %v281_v12 = vld [vmem:[#allocation7] ss:$0 sm:$0xff]  ;;  %v282_v18 = vld [vmem:[%s470_s4] ss:$0 sm:$0xff] }
  0x18   :  { %114 = vmatpush.bf16.msra.mxu0 %v264_v2 }
  0x19   :  { %191 = vmatpush.bf16.msra.mxu1 %v272_v4 }
  0x1b   :  { %231 = vmatmul.msk.bf16.vlgmr.msra.gmra.mxu0 %vm103_vm0, %v82_v5 }
  0x1d   :  { %192 = vmatpush.bf16.msra.mxu1 %v271_v6 }
  0x21   :  { %193 = vmatpush.bf16.msra.mxu1 %v270_v7 }
  0x25   :  { %194 = vmatpush.bf16.msra.mxu1 %v269_v8 }
  0x29   :  { %195 = vmatpush.bf16.msra.mxu1 %v268_v9 }
  0x2d   :  { %196 = vmatpush.bf16.msra.mxu1 %v267_v10 }
  0x31   :  { %197 = vmatpush.bf16.msra.mxu1 %v266_v11 }
  0x98   :  { %v116_v13 = vpop.f32.mrf.mxu0 }
  0x99   :  { %v117_v14 = vadd.f32 %v281_v12, %v116_v13 }
  0x9b   :  { %v120_v15 = vmax.f32 %v117_v14, 0.0 }
  0x9d   :  { %v121_v16 = vpack.c.bf16 %v120_v15, %v120_v15 }
  0x9f   :  { %198 = vmatmul.bf16.vlgmr.msra.gmra.mxu1 %v121_v16 }
  0xa0   :  { %v118_v17 = vpop.f32.mrf.mxu0 }
 0x11c   :  { %v199_v19 = vpop.f32.mrf.mxu1 }
 0x11d   :  { %v200_v20 = vadd.f32 %v282_v18, %v199_v19 }
 0x11f   :  { %203 = vst [vmem:[#allocation10] sm:$0xff] %v200_v20 }
 0x120   :  { %214 = dma.vmem_to_hbm [thread:$0]  %s210_s14, 128, %s212_s17, [#allocation4]  }
 0x124   :  { %v201_v21 = vpop.f32.mrf.mxu1 }
 0x125   :  { %409 = dma.done.wait [#allocation4], 128  }
 0x126   :  { %410 = vsyncadd [#allocation4], 4294967168 }
 0x127   :  { %219 = vsyncpa [#allocation3], 1 }
 0x128   :  { %220 = vsyncpa [#allocation6], 1 }
 0x129   :  { %221 = vsyncpa [#allocation9], 1 }
 0x12a   :  { %222 = vsyncpa [#allocation4], 1 }

</bundles_post_ra>
